<compile_context>
chip_gen: v5e
topology: v5e:2x2
jax: 0.10.0
libtpu: 0.0.40
codegen_flags: <defaults>
</compile_context>

<pallas_src>
import numpy as np
import jax
import jax.numpy as jnp
from jax import lax
from jax.experimental import pallas as pl
from jax.experimental.pallas import tpu as pltpu

# ---------------- config (small, consistent with the module) ----------------
DIM = 64
N_HEADS = 4                    # world_size = 1 -> n_local_heads = 4
Q_LORA_RANK = 32
KV_LORA_RANK = 64
QK_NOPE_HEAD_DIM = 16
QK_ROPE_HEAD_DIM = 16          # must equal nope dim (see reference split)
QK_HEAD_DIM = QK_NOPE_HEAD_DIM + QK_ROPE_HEAD_DIM
V_HEAD_DIM = 16
SOFTMAX_SCALE = QK_HEAD_DIM ** (-0.5)   # max_seq_len == original_seq_len -> no mscale
RMS_EPS = 1e-6

BATCH = 2
SEQ = 8


# ---------------- Pallas kernels ----------------
def _proj_kernel(x_ref, wqa_ref, qnw_ref, wqabs_ref, wqrope_ref,
                 wkva_lat_ref, wkva_pe_ref, kvnw_ref,
                 qabs_ref, qrope_ref, kvlat_ref, kpe_ref):
    """Fused q-path and kv-path projections; everything stays in VMEM.

    x: (BS, DIM). Weights are pre-transposed (in, out); q weights already carry
    SOFTMAX_SCALE and the absorbed wkv_b nope block; rope weight columns are
    pre-deinterleaved ([even | odd] within each head).
    """
    x = x_ref[...]                                                     # (BS, DIM) f32
    # q path: wq_a -> RMSNorm -> absorbed wq_b
    qa = jnp.dot(x, wqa_ref[...], preferred_element_type=jnp.float32)  # (BS, Rq)
    ms = jnp.mean(qa * qa, axis=-1, keepdims=True)
    qn = qa * lax.rsqrt(ms + RMS_EPS) * qnw_ref[...]
    qabs_ref[...] = jnp.dot(qn, wqabs_ref[...],
                            preferred_element_type=jnp.float32)        # (BS, H*C)
    qrope_ref[...] = jnp.dot(qn, wqrope_ref[...],
                             preferred_element_type=jnp.float32)       # (BS, H*R)
    # kv path: wkv_a split into latent / rope halves (weight split at prep time,
    # so no in-kernel lane slicing), RMSNorm on the latent part
    kv = jnp.dot(x, wkva_lat_ref[...], preferred_element_type=jnp.float32)  # (BS, C)
    ms2 = jnp.mean(kv * kv, axis=-1, keepdims=True)
    kvlat_ref[...] = kv * lax.rsqrt(ms2 + RMS_EPS) * kvnw_ref[...]
    kpe_ref[...] = jnp.dot(x, wkva_pe_ref[...],
                           preferred_element_type=jnp.float32)         # (BS, R)


def _attn_out_kernel(q_ref, k_ref, kv_ref, wo_ref, o_ref):
    """Per-batch absorbed MLA attention + absorbed output projection.

    q_ref: (H*S, C+R) rows ordered h*S + s, already scaled by SOFTMAX_SCALE
    k_ref: (S, C+R)   = [kv_latent, k_pe]
    kv_ref:(S, C)     = kv_latent
    wo_ref:(H, C, DIM) absorbed output weight (wkv_b value block contracted with wo)
    o_ref: (S, DIM)   final output for this batch element
    """
    q = q_ref[...]
    k = k_ref[...]
    # single fused score matmul over K = C+R; dot_general contracts the last axes
    # of both operands -> no in-kernel transpose.
    scores = lax.dot_general(q, k, (((1,), (1,)), ((), ())),
                             preferred_element_type=jnp.float32)       # (H*S, S)
    # causal mask generated in-kernel: query position = row % S, key position = col
    qpos = lax.broadcasted_iota(jnp.int32, scores.shape, 0) % SEQ
    kpos = lax.broadcasted_iota(jnp.int32, scores.shape, 1)
    scores = jnp.where(qpos >= kpos, scores, -1e30)
    # softmax in f32; divide moved to the EUP via approx reciprocal
    m = jnp.max(scores, axis=-1, keepdims=True)
    e = jnp.exp(scores - m)
    p = e * pl.reciprocal(jnp.sum(e, axis=-1, keepdims=True), approx=True)
    ctx = jnp.dot(p, kv_ref[...], preferred_element_type=jnp.float32)  # (H*S, C)
    # absorbed output projection, per head (static, sublane-aligned slices of ctx)
    acc = jnp.zeros((SEQ, DIM), jnp.float32)
    for h in range(N_HEADS):
        acc = acc + jnp.dot(ctx[h * SEQ:(h + 1) * SEQ, :], wo_ref[h],
                            preferred_element_type=jnp.float32)        # (S, DIM)
    o_ref[...] = acc.astype(o_ref.dtype)


# ---------------- Pallas wrappers ----------------
def fused_projections(x2, pp):
    BS = x2.shape[0]
    H, C, R = N_HEADS, KV_LORA_RANK, QK_ROPE_HEAD_DIM
    return pl.pallas_call(
        _proj_kernel,
        out_shape=(
            jax.ShapeDtypeStruct((BS, H * C), jnp.float32),   # q_abs (scaled)
            jax.ShapeDtypeStruct((BS, H * R), jnp.float32),   # q_rope (scaled, pre-RoPE)
            jax.ShapeDtypeStruct((BS, C), jnp.float32),       # kv_latent (normed)
            jax.ShapeDtypeStruct((BS, R), jnp.float32),       # k_pe (pre-RoPE)
        ),
    )(x2, pp["wq_a_t"], pp["q_norm"], pp["w_qabs"], pp["w_qrope"],
      pp["wkv_a_lat_t"], pp["wkv_a_pe_t"], pp["kv_norm"])


def mla_attention_out(q_cat, k_cat, kv_lat, w_oabs):
    """q_cat: (B, H*S, C+R), k_cat: (B, S, C+R), kv_lat: (B, S, C),
    w_oabs: (H, C, DIM) -> (B, S, DIM)."""
    B, HS, CR = q_cat.shape
    S = k_cat.shape[1]
    C = kv_lat.shape[2]
    H = w_oabs.shape[0]
    return pl.pallas_call(
        _attn_out_kernel,
        out_shape=jax.ShapeDtypeStruct((B, S, DIM), jnp.float32),
        grid=(B,),
        in_specs=[
            pl.BlockSpec((None, HS, CR), lambda b: (b, 0, 0)),
            pl.BlockSpec((None, S, CR), lambda b: (b, 0, 0)),
            pl.BlockSpec((None, S, C), lambda b: (b, 0, 0)),
            # weight block index is constant across the grid -> fetched once
            pl.BlockSpec((H, C, DIM), lambda b: (0, 0, 0)),
        ],
        out_specs=pl.BlockSpec((None, S, DIM), lambda b: (b, 0, 0)),
        compiler_params=pltpu.CompilerParams(
            dimension_semantics=("parallel",)),
    )(q_cat, k_cat, kv_lat, w_oabs)


# ---------------- glue (rotary / weight absorption / forward) ----------------
def precompute_freqs(seq_len, rope_dim, base=10000.0):
    inv = 1.0 / (base ** (jnp.arange(0, rope_dim, 2, dtype=jnp.float32) / rope_dim))
    t = jnp.arange(seq_len, dtype=jnp.float32)
    ang = jnp.outer(t, inv)                       # (S, rope_dim/2)
    return jnp.cos(ang), jnp.sin(ang)


def apply_rotary_emb(x, cos, sin):
    """Interleaved RoPE (matches torch view_as_complex). Used by the reference only.
    x: (B, S, H, R); cos/sin: (S, R//2)."""
    xr = x.reshape(*x.shape[:-1], -1, 2)
    x0, x1 = xr[..., 0], xr[..., 1]
    c = cos[None, :, None, :]
    s = sin[None, :, None, :]
    y0 = x0 * c - x1 * s
    y1 = x0 * s + x1 * c
    return jnp.stack((y0, y1), axis=-1).reshape(x.shape)


def rope_half(x, cos, sin):
    """Rotate-half RoPE on a pre-deinterleaved last axis ([even | odd])."""
    half = x.shape[-1] // 2
    x0 = x[..., :half]
    x1 = x[..., half:]
    return jnp.concatenate([x0 * cos - x1 * sin, x0 * sin + x1 * cos], axis=-1)


def prepare_params(p):
    """One-time weight prep: transpose to (in, out), absorb wkv_b into wq_b / wo,
    fold SOFTMAX_SCALE into the q weights, deinterleave the rope weight columns."""
    H, Dn, R, C, V = N_HEADS, QK_NOPE_HEAD_DIM, QK_ROPE_HEAD_DIM, KV_LORA_RANK, V_HEAD_DIM
    wq_b = p["wq_b"].reshape(H, QK_HEAD_DIM, Q_LORA_RANK)      # (H, Dn+R, Rq)
    wkv_b = p["wkv_b"].reshape(H, Dn + V, C)
    wk = wkv_b[:, :Dn, :]                                      # (H, Dn, C)
    wv = wkv_b[:, Dn:, :]                                      # (H, V, C)  == [:, -V:, :]
    # absorbed q-nope weight (Rq, H*C), softmax scale folded in
    w_qabs = (jnp.einsum("hdr,hdc->rhc", wq_b[:, :Dn, :], wk)
              .reshape(Q_LORA_RANK, H * C)) * SOFTMAX_SCALE
    # q rope weight (Rq, H*R): columns deinterleaved to [even|odd] per head so the
    # kernel/glue RoPE is a rotate-half; scale folded in (RoPE is linear -> commutes)
    wqr = wq_b[:, Dn:, :]                                      # (H, R, Rq)
    wqr = (wqr.reshape(H, R // 2, 2, Q_LORA_RANK)
              .transpose(0, 2, 1, 3).reshape(H, R, Q_LORA_RANK))
    w_qrope = wqr.transpose(2, 0, 1).reshape(Q_LORA_RANK, H * R) * SOFTMAX_SCALE
    # absorbed output weight (H, C, DIM): value block contracted with wo
    wo_r = p["wo"].reshape(DIM, H, V)
    w_oabs = jnp.einsum("hvc,dhv->hcd", wv, wo_r)              # (H, C, DIM)
    wkv_a = p["wkv_a"]                                         # (C+R, DIM) torch layout
    # k_pe weight: same deinterleave permutation (q·k dot is invariant to it)
    wpe = wkv_a[C:, :].reshape(R // 2, 2, DIM).transpose(1, 0, 2).reshape(R, DIM)
    return {
        "wq_a_t": p["wq_a"].T,                                 # (DIM, Rq)
        "q_norm": p["q_norm"],                                 # (1, Rq)
        "w_qabs": w_qabs,
        "w_qrope": w_qrope,
        "wkv_a_lat_t": wkv_a[:C, :].T,                         # (DIM, C)
        "wkv_a_pe_t": wpe.T,                                   # (DIM, R) deinterleaved
        "kv_norm": p["kv_norm"],                               # (1, C)
        "w_oabs": w_oabs,                                      # (H, C, DIM)
    }


def mla_forward(pp, x, cos, sin):
    """MLA forward, attn_impl='absorb', start_pos=0 (fresh cache)."""
    B, S, _ = x.shape
    H, C, R = N_HEADS, KV_LORA_RANK, QK_ROPE_HEAD_DIM
    x2 = x.reshape(B * S, DIM)

    # one fused kernel for both projection chains
    q_abs, q_rope, kv_lat, k_pe = fused_projections(x2, pp)

    # rotate-half RoPE (tiny, fused by XLA; columns pre-deinterleaved at prep time)
    q_pe = rope_half(q_rope.reshape(B, S, H, R),
                     cos[None, :, None, :], sin[None, :, None, :])      # (B,S,H,R)
    k_pe = rope_half(k_pe.reshape(B, S, R), cos[None, :, :], sin[None, :, :])  # (B,S,R)

    # fuse the two score matmuls into one: K = C + R; rows head-major (h*S + s)
    q_cat = jnp.concatenate([q_abs.reshape(B, S, H, C), q_pe], axis=-1)  # (B,S,H,C+R)
    q_cat = jnp.transpose(q_cat, (0, 2, 1, 3)).reshape(B, H * S, C + R)
    kv_lat = kv_lat.reshape(B, S, C)
    k_cat = jnp.concatenate([kv_lat, k_pe], axis=-1)                     # (B, S, C+R)
    # TODO(synk): persistent kv_cache/pe_cache buffers are not modeled; with
    # start_pos=0 attention reads exactly the freshly written entries, so the
    # current-sequence kv_lat / k_pe are used directly.

    # attention + absorbed output projection fused in one kernel
    return mla_attention_out(q_cat, k_cat, kv_lat, pp["w_oabs"])         # (B, S, DIM)


# ---------------- pure-JAX reference (faithful to the torch math) ----------------
def mla_forward_ref(params, x, cos, sin, mask):
    B, S, _ = x.shape
    H = N_HEADS

    def lin(a, w):
        return a @ w.T

    def rms(a, w):
        a32 = a.astype(jnp.float32)
        return a32 * lax.rsqrt(jnp.mean(a32 * a32, -1, keepdims=True) + RMS_EPS) * w

    q = lin(rms(lin(x, params["wq_a"]), params["q_norm"][0]), params["wq_b"])
    q = q.reshape(B, S, H, QK_HEAD_DIM)
    q_nope, q_pe = q[..., :QK_NOPE_HEAD_DIM], q[..., QK_NOPE_HEAD_DIM:]
    q_pe = apply_rotary_emb(q_pe, cos, sin)
    kvf = lin(x, params["wkv_a"])
    kv_lat, k_pe = kvf[..., :KV_LORA_RANK], kvf[..., KV_LORA_RANK:]
    k_pe = apply_rotary_emb(k_pe[:, :, None, :], cos, sin)[:, :, 0, :]
    kv_lat = rms(kv_lat, params["kv_norm"][0])
    wkv_b = params["wkv_b"].reshape(H, QK_NOPE_HEAD_DIM + V_HEAD_DIM, KV_LORA_RANK)
    q_abs = jnp.einsum("bshd,hdc->bshc", q_nope, wkv_b[:, :QK_NOPE_HEAD_DIM])
    scores = (jnp.einsum("bshc,btc->bsht", q_abs, kv_lat)
              + jnp.einsum("bshr,btr->bsht", q_pe, k_pe)) * SOFTMAX_SCALE
    scores = scores + mask[:, None, :]
    scores = jax.nn.softmax(scores.astype(jnp.float32), axis=-1)
    o = jnp.einsum("bsht,btc->bshc", scores, kv_lat)
    o = jnp.einsum("bshc,hdc->bshd", o, wkv_b[:, -V_HEAD_DIM:])
    return lin(o.reshape(B, S, H * V_HEAD_DIM), params["wo"])


# ---------------- main ----------------
if __name__ == "__main__":
    key = jax.random.PRNGKey(0)
    ks = jax.random.split(key, 8)

    def init_w(k, shape):
        return jax.random.normal(k, shape, jnp.float32) * 0.02

    params = {
        "wq_a":   init_w(ks[0], (Q_LORA_RANK, DIM)),
        "q_norm": jnp.ones((1, Q_LORA_RANK), jnp.float32),
        "wq_b":   init_w(ks[1], (N_HEADS * QK_HEAD_DIM, Q_LORA_RANK)),
        "wkv_a":  init_w(ks[2], (KV_LORA_RANK + QK_ROPE_HEAD_DIM, DIM)),
        "kv_norm": jnp.ones((1, KV_LORA_RANK), jnp.float32),
        "wkv_b":  init_w(ks[3], (N_HEADS * (QK_NOPE_HEAD_DIM + V_HEAD_DIM), KV_LORA_RANK)),
        "wo":     init_w(ks[4], (DIM, N_HEADS * V_HEAD_DIM)),
    }

    x = jax.random.normal(ks[5], (BATCH, SEQ, DIM), jnp.float32)
    cos, sin = precompute_freqs(SEQ, QK_ROPE_HEAD_DIM)

    pp = prepare_params(params)                      # one-time weight prep
    fwd = jax.jit(mla_forward)                       # fuses the tiny glue ops too
    out = fwd(pp, x, cos, sin)
    out = jax.block_until_ready(out)

    # reference uses the torch-style causal mask (kernel builds it in-VMEM via iota)
    mask = jnp.triu(jnp.full((SEQ, SEQ), -1e30, jnp.float32), k=1)
    ref = mla_forward_ref(params, x, cos, sin, mask)
    np.testing.assert_allclose(np.asarray(out), np.asarray(ref), rtol=1e-3, atol=1e-4)

    assert out.shape == (BATCH, SEQ, DIM)
    print("KERNEL_OK")
</pallas_src>

<mosaic_0001>
module attributes {stable_mosaic.version = 11 : i64} {
  func.func @_proj_kernel(%arg0: memref<16x64xf32, #tpu.memory_space<vmem>>, %arg1: memref<64x32xf32, #tpu.memory_space<vmem>>, %arg2: memref<1x32xf32, #tpu.memory_space<vmem>>, %arg3: memref<32x256xf32, #tpu.memory_space<vmem>>, %arg4: memref<32x64xf32, #tpu.memory_space<vmem>>, %arg5: memref<64x64xf32, #tpu.memory_space<vmem>>, %arg6: memref<64x16xf32, #tpu.memory_space<vmem>>, %arg7: memref<1x64xf32, #tpu.memory_space<vmem>>, %arg8: memref<16x256xf32, #tpu.memory_space<vmem>>, %arg9: memref<16x64xf32, #tpu.memory_space<vmem>>, %arg10: memref<16x64xf32, #tpu.memory_space<vmem>>, %arg11: memref<16x16xf32, #tpu.memory_space<vmem>>) attributes {dimension_semantics = [], scalar_prefetch = 0 : i64, scratch_operands = 0 : i64, tpu.core_type = #tpu.core_type<tc>} {
    %c0 = arith.constant 0 : index
    %c0_0 = arith.constant 0 : index
    %0 = vector.load %arg0[%c0, %c0_0] : memref<16x64xf32, #tpu.memory_space<vmem>>, vector<16x64xf32>
    %c0_1 = arith.constant 0 : index
    %c0_2 = arith.constant 0 : index
    %1 = vector.load %arg1[%c0_1, %c0_2] : memref<64x32xf32, #tpu.memory_space<vmem>>, vector<64x32xf32>
    %cst = arith.constant dense<0.000000e+00> : vector<16x32xf32>
    %2 = tpu.matmul %0, %1, %cst {dimension_numbers = #tpu.dot_dimension_numbers<[1], [0], [0], [1], [0, 0, 1, 1], [], []>} : vector<16x64xf32>, vector<64x32xf32>, vector<16x32xf32> -> vector<16x32xf32>
    %3 = arith.mulf %2, %2 : vector<16x32xf32>
    %cst_3 = arith.constant dense<0.000000e+00> : vector<16xf32>
    %4 = vector.multi_reduction <add>, %3, %cst_3 [1] : vector<16x32xf32> to vector<16xf32>
    %5 = vector.shape_cast %4 : vector<16xf32> to vector<16x1xf32>
    %cst_4 = arith.constant 3.200000e+01 : f32
    %6 = vector.broadcast %cst_4 : f32 to vector<16x1xf32>
    %7 = arith.divf %5, %6 : vector<16x1xf32>
    %cst_5 = arith.constant 9.99999997E-7 : f32
    %8 = vector.broadcast %cst_5 : f32 to vector<16x1xf32>
    %9 = arith.addf %7, %8 : vector<16x1xf32>
    %10 = math.rsqrt %9 : vector<16x1xf32>
    %11 = vector.broadcast %10 : vector<16x1xf32> to vector<16x32xf32>
    %12 = arith.mulf %2, %11 : vector<16x32xf32>
    %c0_6 = arith.constant 0 : index
    %c0_7 = arith.constant 0 : index
    %13 = vector.load %arg2[%c0_6, %c0_7] : memref<1x32xf32, #tpu.memory_space<vmem>>, vector<1x32xf32>
    %14 = vector.broadcast %13 : vector<1x32xf32> to vector<16x32xf32>
    %15 = arith.mulf %12, %14 : vector<16x32xf32>
    %c0_8 = arith.constant 0 : index
    %c0_9 = arith.constant 0 : index
    %16 = vector.load %arg3[%c0_8, %c0_9] : memref<32x256xf32, #tpu.memory_space<vmem>>, vector<32x256xf32>
    %cst_10 = arith.constant dense<0.000000e+00> : vector<16x256xf32>
    %17 = tpu.matmul %15, %16, %cst_10 {dimension_numbers = #tpu.dot_dimension_numbers<[1], [0], [0], [1], [0, 0, 1, 1], [], []>} : vector<16x32xf32>, vector<32x256xf32>, vector<16x256xf32> -> vector<16x256xf32>
    %c0_11 = arith.constant 0 : index
    %c0_12 = arith.constant 0 : index
    %18 = vector.load %arg8[%c0_11, %c0_12] : memref<16x256xf32, #tpu.memory_space<vmem>>, vector<16x256xf32>
    tpu.vector_store %arg8[%c0_11, %c0_12], %17 {strides = array<i32>} : memref<16x256xf32, #tpu.memory_space<vmem>>, vector<16x256xf32>,
    %c0_13 = arith.constant 0 : index
    %c0_14 = arith.constant 0 : index
    %19 = vector.load %arg4[%c0_13, %c0_14] : memref<32x64xf32, #tpu.memory_space<vmem>>, vector<32x64xf32>
    %cst_15 = arith.constant dense<0.000000e+00> : vector<16x64xf32>
    %20 = tpu.matmul %15, %19, %cst_15 {dimension_numbers = #tpu.dot_dimension_numbers<[1], [0], [0], [1], [0, 0, 1, 1], [], []>} : vector<16x32xf32>, vector<32x64xf32>, vector<16x64xf32> -> vector<16x64xf32>
    %c0_16 = arith.constant 0 : index
    %c0_17 = arith.constant 0 : index
    %21 = vector.load %arg9[%c0_16, %c0_17] : memref<16x64xf32, #tpu.memory_space<vmem>>, vector<16x64xf32>
    tpu.vector_store %arg9[%c0_16, %c0_17], %20 {strides = array<i32>} : memref<16x64xf32, #tpu.memory_space<vmem>>, vector<16x64xf32>,
    %c0_18 = arith.constant 0 : index
    %c0_19 = arith.constant 0 : index
    %22 = vector.load %arg5[%c0_18, %c0_19] : memref<64x64xf32, #tpu.memory_space<vmem>>, vector<64x64xf32>
    %cst_20 = arith.constant dense<0.000000e+00> : vector<16x64xf32>
    %23 = tpu.matmul %0, %22, %cst_20 {dimension_numbers = #tpu.dot_dimension_numbers<[1], [0], [0], [1], [0, 0, 1, 1], [], []>} : vector<16x64xf32>, vector<64x64xf32>, vector<16x64xf32> -> vector<16x64xf32>
    %24 = arith.mulf %23, %23 : vector<16x64xf32>
    %cst_21 = arith.constant dense<0.000000e+00> : vector<16xf32>
    %25 = vector.multi_reduction <add>, %24, %cst_21 [1] : vector<16x64xf32> to vector<16xf32>
    %26 = vector.shape_cast %25 : vector<16xf32> to vector<16x1xf32>
    %cst_22 = arith.constant 6.400000e+01 : f32
    %27 = vector.broadcast %cst_22 : f32 to vector<16x1xf32>
    %28 = arith.divf %26, %27 : vector<16x1xf32>
    %cst_23 = arith.constant 9.99999997E-7 : f32
    %29 = vector.broadcast %cst_23 : f32 to vector<16x1xf32>
    %30 = arith.addf %28, %29 : vector<16x1xf32>
    %31 = math.rsqrt %30 : vector<16x1xf32>
    %32 = vector.broadcast %31 : vector<16x1xf32> to vector<16x64xf32>
    %33 = arith.mulf %23, %32 : vector<16x64xf32>
    %c0_24 = arith.constant 0 : index
    %c0_25 = arith.constant 0 : index
    %34 = vector.load %arg7[%c0_24, %c0_25] : memref<1x64xf32, #tpu.memory_space<vmem>>, vector<1x64xf32>
    %35 = vector.broadcast %34 : vector<1x64xf32> to vector<16x64xf32>
    %36 = arith.mulf %33, %35 : vector<16x64xf32>
    %c0_26 = arith.constant 0 : index
    %c0_27 = arith.constant 0 : index
    %37 = vector.load %arg10[%c0_26, %c0_27] : memref<16x64xf32, #tpu.memory_space<vmem>>, vector<16x64xf32>
    tpu.vector_store %arg10[%c0_26, %c0_27], %36 {strides = array<i32>} : memref<16x64xf32, #tpu.memory_space<vmem>>, vector<16x64xf32>,
    %c0_28 = arith.constant 0 : index
    %c0_29 = arith.constant 0 : index
    %38 = vector.load %arg6[%c0_28, %c0_29] : memref<64x16xf32, #tpu.memory_space<vmem>>, vector<64x16xf32>
    %cst_30 = arith.constant dense<0.000000e+00> : vector<16x16xf32>
    %39 = tpu.matmul %0, %38, %cst_30 {dimension_numbers = #tpu.dot_dimension_numbers<[1], [0], [0], [1], [0, 0, 1, 1], [], []>} : vector<16x64xf32>, vector<64x16xf32>, vector<16x16xf32> -> vector<16x16xf32>
    %c0_31 = arith.constant 0 : index
    %c0_32 = arith.constant 0 : index
    %40 = vector.load %arg11[%c0_31, %c0_32] : memref<16x16xf32, #tpu.memory_space<vmem>>, vector<16x16xf32>
    tpu.vector_store %arg11[%c0_31, %c0_32], %39 {strides = array<i32>} : memref<16x16xf32, #tpu.memory_space<vmem>>, vector<16x16xf32>,
    return
  }
}

module attributes {stable_mosaic.version = 11 : i64} {
  func.func @_attn_out_kernel(%arg0: i32, %arg1: memref<1x32x80xf32, #tpu.memory_space<vmem>>, %arg2: memref<1x8x80xf32, #tpu.memory_space<vmem>>, %arg3: memref<1x8x64xf32, #tpu.memory_space<vmem>>, %arg4: memref<4x64x64xf32, #tpu.memory_space<vmem>>, %arg5: memref<1x8x64xf32, #tpu.memory_space<vmem>>) attributes {dimension_semantics = [#tpu.dimension_semantics<parallel>], iteration_bounds = array<i64: 2>, scalar_prefetch = 0 : i64, scratch_operands = 0 : i64, tpu.core_type = #tpu.core_type<tc>, window_params = [{transform_indices = @transform_0, window_bounds = array<i64: 1, 32, 80>}, {transform_indices = @transform_1, window_bounds = array<i64: 1, 8, 80>}, {transform_indices = @transform_2, window_bounds = array<i64: 1, 8, 64>}, {pipeline_mode = #tpu.pipeline_mode<synchronous>, transform_indices = @transform_3, window_bounds = array<i64: 4, 64, 64>}, {transform_indices = @transform_4, window_bounds = array<i64: 1, 8, 64>}]} {
    %c0 = arith.constant 0 : index
    %c0_0 = arith.constant 0 : index
    %c0_1 = arith.constant 0 : index
    %0 = vector.load %arg1[%c0, %c0_0, %c0_1] : memref<1x32x80xf32, #tpu.memory_space<vmem>>, vector<1x32x80xf32>
    %1 = vector.shape_cast %0 : vector<1x32x80xf32> to vector<32x80xf32>
    %c0_2 = arith.constant 0 : index
    %c0_3 = arith.constant 0 : index
    %c0_4 = arith.constant 0 : index
    %2 = vector.load %arg2[%c0_2, %c0_3, %c0_4] : memref<1x8x80xf32, #tpu.memory_space<vmem>>, vector<1x8x80xf32>
    %3 = vector.shape_cast %2 : vector<1x8x80xf32> to vector<8x80xf32>
    %cst = arith.constant dense<0.000000e+00> : vector<32x8xf32>
    %4 = tpu.matmul %1, %3, %cst {dimension_numbers = #tpu.dot_dimension_numbers<[1], [1], [0], [0], [0, 0, 1, 0], [], []>} : vector<32x80xf32>, vector<8x80xf32>, vector<32x8xf32> -> vector<32x8xf32>
    %5 = tpu.iota {dimensions = array<i32: 0>} : vector<32x8xi32>
    %c8_i32 = arith.constant 8 : i32
    %c0_i32 = arith.constant 0 : i32
    %6 = arith.cmpi eq, %c8_i32, %c0_i32 : i32
    %c1_i32 = arith.constant 1 : i32
    %7 = arith.select %6, %c1_i32, %c8_i32 : i32
    %8 = vector.broadcast %7 : i32 to vector<32x8xi32>
    %9 = arith.remsi %5, %8 : vector<32x8xi32>
    %c0_i32_5 = arith.constant 0 : i32
    %10 = vector.broadcast %c0_i32_5 : i32 to vector<32x8xi32>
    %11 = arith.cmpi ne, %9, %10 : vector<32x8xi32>
    %c0_i32_6 = arith.constant 0 : i32
    %12 = vector.broadcast %c0_i32_6 : i32 to vector<32x8xi32>
    %13 = arith.cmpi slt, %9, %12 : vector<32x8xi32>
    %c0_i32_7 = arith.constant 0 : i32
    %14 = arith.cmpi slt, %7, %c0_i32_7 : i32
    %15 = vector.broadcast %14 : i1 to vector<32x8xi1>
    %16 = vector.broadcast %15 : vector<32x8xi1> to vector<32x8xi1>
    %17 = arith.xori %13, %16 : vector<32x8xi1>
    %18 = arith.andi %17, %11 : vector<32x8xi1>
    %19 = vector.broadcast %7 : i32 to vector<32x8xi32>
    %20 = arith.addi %9, %19 : vector<32x8xi32>
    %21 = arith.select %18, %20, %9 : vector<32x8xi1>, vector<32x8xi32>
    %22 = tpu.iota {dimensions = array<i32: 1>} : vector<32x8xi32>
    %23 = arith.cmpi sge, %21, %22 : vector<32x8xi32>
    %cst_8 = arith.constant -1.000000e+30 : f32
    %24 = vector.broadcast %cst_8 : f32 to vector<32x8xf32>
    %25 = arith.select %23, %4, %24 : vector<32x8xi1>, vector<32x8xf32>
    %cst_9 = arith.constant dense<0xFF800000> : vector<32xf32>
    %26 = vector.multi_reduction <maximumf>, %25, %cst_9 [1] : vector<32x8xf32> to vector<32xf32>
    %27 = vector.shape_cast %26 : vector<32xf32> to vector<32x1xf32>
    %28 = vector.broadcast %27 : vector<32x1xf32> to vector<32x8xf32>
    %29 = arith.subf %25, %28 : vector<32x8xf32>
    %30 = math.exp %29 : vector<32x8xf32>
    %cst_10 = arith.constant dense<0.000000e+00> : vector<32xf32>
    %31 = vector.multi_reduction <add>, %30, %cst_10 [1] : vector<32x8xf32> to vector<32xf32>
    %32 = vector.shape_cast %31 : vector<32xf32> to vector<32x1xf32>
    %33 = tpu.reciprocal %32 {approx = true} : vector<32x1xf32> -> vector<32x1xf32>
    %34 = vector.broadcast %33 : vector<32x1xf32> to vector<32x8xf32>
    %35 = arith.mulf %30, %34 : vector<32x8xf32>
    %c0_11 = arith.constant 0 : index
    %c0_12 = arith.constant 0 : index
    %c0_13 = arith.constant 0 : index
    %36 = vector.load %arg3[%c0_11, %c0_12, %c0_13] : memref<1x8x64xf32, #tpu.memory_space<vmem>>, vector<1x8x64xf32>
    %37 = vector.shape_cast %36 : vector<1x8x64xf32> to vector<8x64xf32>
    %cst_14 = arith.constant dense<0.000000e+00> : vector<32x64xf32>
    %38 = tpu.matmul %35, %37, %cst_14 {dimension_numbers = #tpu.dot_dimension_numbers<[1], [0], [0], [1], [0, 0, 1, 1], [], []>} : vector<32x8xf32>, vector<8x64xf32>, vector<32x64xf32> -> vector<32x64xf32>
    %cst_15 = arith.constant 0.000000e+00 : f32
    %39 = vector.broadcast %cst_15 : f32 to vector<8x64xf32>
    %40 = vector.extract_strided_slice %38 {offsets = [0, 0], sizes = [8, 64], strides = [1, 1]} : vector<32x64xf32> to vector<8x64xf32>
    %c0_16 = arith.constant 0 : index
    %c0_17 = arith.constant 0 : index
    %c0_18 = arith.constant 0 : index
    %41 = vector.load %arg4[%c0_16, %c0_17, %c0_18] : memref<4x64x64xf32, #tpu.memory_space<vmem>>, vector<1x64x64xf32>
    %42 = vector.shape_cast %41 : vector<1x64x64xf32> to vector<64x64xf32>
    %cst_19 = arith.constant dense<0.000000e+00> : vector<8x64xf32>
    %43 = tpu.matmul %40, %42, %cst_19 {dimension_numbers = #tpu.dot_dimension_numbers<[1], [0], [0], [1], [0, 0, 1, 1], [], []>} : vector<8x64xf32>, vector<64x64xf32>, vector<8x64xf32> -> vector<8x64xf32>
    %44 = arith.addf %39, %43 : vector<8x64xf32>
    %45 = vector.extract_strided_slice %38 {offsets = [8, 0], sizes = [8, 64], strides = [1, 1]} : vector<32x64xf32> to vector<8x64xf32>
    %c1 = arith.constant 1 : index
    %c0_20 = arith.constant 0 : index
    %c0_21 = arith.constant 0 : index
    %46 = vector.load %arg4[%c1, %c0_20, %c0_21] : memref<4x64x64xf32, #tpu.memory_space<vmem>>, vector<1x64x64xf32>
    %47 = vector.shape_cast %46 : vector<1x64x64xf32> to vector<64x64xf32>
    %cst_22 = arith.constant dense<0.000000e+00> : vector<8x64xf32>
    %48 = tpu.matmul %45, %47, %cst_22 {dimension_numbers = #tpu.dot_dimension_numbers<[1], [0], [0], [1], [0, 0, 1, 1], [], []>} : vector<8x64xf32>, vector<64x64xf32>, vector<8x64xf32> -> vector<8x64xf32>
    %49 = arith.addf %44, %48 : vector<8x64xf32>
    %50 = vector.extract_strided_slice %38 {offsets = [16, 0], sizes = [8, 64], strides = [1, 1]} : vector<32x64xf32> to vector<8x64xf32>
    %c2 = arith.constant 2 : index
    %c0_23 = arith.constant 0 : index
    %c0_24 = arith.constant 0 : index
    %51 = vector.load %arg4[%c2, %c0_23, %c0_24] : memref<4x64x64xf32, #tpu.memory_space<vmem>>, vector<1x64x64xf32>
    %52 = vector.shape_cast %51 : vector<1x64x64xf32> to vector<64x64xf32>
    %cst_25 = arith.constant dense<0.000000e+00> : vector<8x64xf32>
    %53 = tpu.matmul %50, %52, %cst_25 {dimension_numbers = #tpu.dot_dimension_numbers<[1], [0], [0], [1], [0, 0, 1, 1], [], []>} : vector<8x64xf32>, vector<64x64xf32>, vector<8x64xf32> -> vector<8x64xf32>
    %54 = arith.addf %49, %53 : vector<8x64xf32>
    %55 = vector.extract_strided_slice %38 {offsets = [24, 0], sizes = [8, 64], strides = [1, 1]} : vector<32x64xf32> to vector<8x64xf32>
    %c3 = arith.constant 3 : index
    %c0_26 = arith.constant 0 : index
    %c0_27 = arith.constant 0 : index
    %56 = vector.load %arg4[%c3, %c0_26, %c0_27] : memref<4x64x64xf32, #tpu.memory_space<vmem>>, vector<1x64x64xf32>
    %57 = vector.shape_cast %56 : vector<1x64x64xf32> to vector<64x64xf32>
    %cst_28 = arith.constant dense<0.000000e+00> : vector<8x64xf32>
    %58 = tpu.matmul %55, %57, %cst_28 {dimension_numbers = #tpu.dot_dimension_numbers<[1], [0], [0], [1], [0, 0, 1, 1], [], []>} : vector<8x64xf32>, vector<64x64xf32>, vector<8x64xf32> -> vector<8x64xf32>
    %59 = arith.addf %54, %58 : vector<8x64xf32>
    %c0_29 = arith.constant 0 : index
    %c0_30 = arith.constant 0 : index
    %c0_31 = arith.constant 0 : index
    %60 = vector.load %arg5[%c0_29, %c0_30, %c0_31] : memref<1x8x64xf32, #tpu.memory_space<vmem>>, vector<1x8x64xf32>
    %61 = vector.shape_cast %60 : vector<1x8x64xf32> to vector<8x64xf32>
    %62 = vector.shape_cast %59 : vector<8x64xf32> to vector<1x8x64xf32>
    tpu.vector_store %arg5[%c0_29, %c0_30, %c0_31], %62 {strides = array<i32>} : memref<1x8x64xf32, #tpu.memory_space<vmem>>, vector<1x8x64xf32>,
    return
  }
  func.func @transform_0(%arg0: i32) -> (i32, i32, i32) {
    %c0_i32 = arith.constant 0 : i32
    %c0_i32_0 = arith.constant 0 : i32
    %c0_i32_1 = arith.constant 0 : i32
    return %arg0, %c0_i32, %c0_i32_0 : i32, i32, i32
  }
  func.func @transform_1(%arg0: i32) -> (i32, i32, i32) {
    %c0_i32 = arith.constant 0 : i32
    %c0_i32_0 = arith.constant 0 : i32
    %c0_i32_1 = arith.constant 0 : i32
    return %arg0, %c0_i32, %c0_i32_0 : i32, i32, i32
  }
  func.func @transform_2(%arg0: i32) -> (i32, i32, i32) {
    %c0_i32 = arith.constant 0 : i32
    %c0_i32_0 = arith.constant 0 : i32
    %c0_i32_1 = arith.constant 0 : i32
    return %arg0, %c0_i32, %c0_i32_0 : i32, i32, i32
  }
  func.func @transform_3(%arg0: i32) -> (i32, i32, i32) {
    %c0_i32 = arith.constant 0 : i32
    %c0_i32_0 = arith.constant 0 : i32
    %c0_i32_1 = arith.constant 0 : i32
    %c0_i32_2 = arith.constant 0 : i32
    return %c0_i32, %c0_i32_0, %c0_i32_1 : i32, i32, i32
  }
  func.func @transform_4(%arg0: i32) -> (i32, i32, i32) {
    %c0_i32 = arith.constant 0 : i32
    %c0_i32_0 = arith.constant 0 : i32
    %c0_i32_1 = arith.constant 0 : i32
    return %arg0, %c0_i32, %c0_i32_0 : i32, i32, i32
  }
}

</mosaic_0001>

<bundles_post_ra>
// kernel: mla_forward.2
= control target key start
LH: loop header
LB: loop body
LE: loop exit
PB: predicated region body
PF: predicated region fallthrough
CT: control target
= control target key end

     0   :  { %17 = vsyncpa [#allocation3], 0  ;;  %s426_s20 = smov [#allocation2]   ;;  %s427_s22 = smov 128   ;;  %s672_s0 = inlined_call_operand.vmem [shape: f32[16,64], index: 0, kind: input, shape index: {}]   ;;  %s673_s1 = inlined_call_operand.vmem [shape: f32[64,32], index: 1, kind: input, shape index: {}]   ;;  %s674_s2 = inlined_call_operand.vmem [shape: f32[1,32], index: 2, kind: input, shape index: {}]   ;;  %s675_s3 = inlined_call_operand.vmem [shape: f32[32,256], index: 3, kind: input, shape index: {}]   ;;  %s676_s4 = inlined_call_operand.hbm [shape: f32[32,64], index: 4, kind: input, shape index: {}]   ;;  %s677_s5 = inlined_call_operand.vmem [shape: f32[64,64], index: 5, kind: input, shape index: {}]   ;;  %s678_s6 = inlined_call_operand.vmem [shape: f32[64,16], index: 6, kind: input, shape index: {}]   ;;  %s679_s7 = inlined_call_operand.vmem [shape: f32[1,64], index: 7, kind: input, shape index: {}]   ;;  %s680_s8 = inlined_call_operand.vmem [shape: f32[16,256], index: 8, kind: output, shape index: {0}]   ;;  %s681_s9 = inlined_call_operand.vmem [shape: f32[16,64], index: 9, kind: output, shape index: {1}]   ;;  %s682_s10 = inlined_call_operand.vmem [shape: f32[16,64], index: 10, kind: output, shape index: {2}]   ;;  %s683_s11 = inlined_call_operand.vmem [shape: f32[16,16], index: 11, kind: output, shape index: {3}]  }
   0x1   :  { %s30_s19 = sshll.u32 %s676_s4, 4  ;;  %s32_s21 = sshll.u32 %s426_s20, 4  ;;  %s31_s19 = int_to_ptr.hbm [resolvable:$true] %s30_s19  ;;  %s33_s21 = int_to_ptr.vmem [resolvable:$true] %s32_s21 }
   0x2   :  { %s428_s23 = smov 8  }
   0x3   :  { %38 = dma.hbm_to_vmem [thread:$0]  %s31_s19, 512, %s33_s21, [#allocation3], %s427_s22, %s427_s22, %s428_s23  }
   0x4   :  { %424 = dma.done.wait [#allocation3], 512  }
   0x5   :  { %425 = vsyncadd [#allocation3], 4294966784  ;;  %v58_v0 = vld [vmem:[%s673_s1 + $0x38] sm:$0xff]  ;;  %v57_v1 = vld [vmem:[%s673_s1 + $0x30] sm:$0xff]  ;;  %vm59_vm0 = vcmask 523264   ;;  %vm91_vm1 = vcmask 261120  }
   0x6   :  { %74 = vmatpush.msra.mxu0 %v58_v0  ;;  %v56_v2 = vld [vmem:[%s673_s1 + $0x28] sm:$0xff]  ;;  %v55_v3 = vld [vmem:[%s673_s1 + $0x20] sm:$0xff]  ;;  %v54_v4 = vld [vmem:[%s673_s1 + $0x18] sm:$0xff]  ;;  %v429_v16 = vmov 32.0   ;;  %vm341_vm10 = vcmask 130048  }
   0x7   :  { %v53_v5 = vld [vmem:[%s673_s1 + $0x10] sm:$0xff]  ;;  %v52_v6 = vld [vmem:[%s673_s1 + $0x8] sm:$0xff]  ;;  %v51_v7 = vld [vmem:[%s673_s1] sm:$0xff]  ;;  %388 = vrcp.f32 %v429_v16 }
   0x8   :  { %75 = vmatpush.msra.mxu0 %v57_v1  ;;  %v521_v8 = vld [vmem:[%s672_s0] sm:$0xff]  ;;  %v528_v9 = vld [vmem:[%s672_s0 + $0x8] sm:$0xff]  ;;  %v143_v20 = vld [vmem:[%s675_s3 + $0x30] sm:$0xff] }
   0x9   :  { %v144_v21 = vld [vmem:[%s675_s3 + $0x38] sm:$0xff]  ;;  %163 = vmatpush.msra.mxu1 %v143_v20  ;;  %v141_v23 = vld [vmem:[%s675_s3 + $0x20] sm:$0xff]  ;;  %v142_v24 = vld [vmem:[%s675_s3 + $0x28] sm:$0xff] }
   0xa   :  { %76 = vmatpush.msra.mxu0 %v56_v2  ;;  %v204_v22 = vld [vmem:[#allocation2 + $0x18] sm:$0xff]  ;;  %186 = vmatpush.msra.mxu2 %v144_v21  ;;  %v203_v25 = vld [vmem:[#allocation2 + $0x10] sm:$0xff]  ;;  %v202_v29 = vld [vmem:[#allocation2 + $0x8] sm:$0xff] }
   0xb   :  { %217 = vmatpush.msra.mxu3 %v204_v22  ;;  %164 = vmatpush.msra.mxu1 %v141_v23  ;;  %v139_v27 = vld [vmem:[%s675_s3 + $0x10] sm:$0xff]  ;;  %v140_v28 = vld [vmem:[%s675_s3 + $0x18] sm:$0xff]  ;;  %v137_v30 = vld [vmem:[%s675_s3] sm:$0xff] }
   0xc   :  { %77 = vmatpush.msra.mxu0 %v55_v3  ;;  %187 = vmatpush.msra.mxu2 %v142_v24  ;;  %v138_v31 = vld [vmem:[%s675_s3 + $0x8] sm:$0xff]  ;;  %v201_v32 = vld [vmem:[#allocation2] sm:$0xff]  ;;  %v237_v34 = vld [vmem:[%s677_s5 + $0x38] sm:$0xff]  ;;  %v430_v24 = vmov 64.0  }
   0xd   :  { %v389_v17 = vpop.eup %388  ;;  %218 = vmatpush.msra.mxu3 %v203_v25  ;;  %165 = vmatpush.msra.mxu1 %v139_v27  ;;  %v236_v35 = vld [vmem:[%s677_s5 + $0x30] sm:$0xff]  ;;  %v235_v37 = vld [vmem:[%s677_s5 + $0x28] sm:$0xff]  ;;  %v234_v39 = vld [vmem:[%s677_s5 + $0x20] sm:$0xff] }
   0xe   :  { %78 = vmatpush.msra.mxu0 %v54_v4  ;;  %v99_v18 = vmul.f32 32.0, %v389_v17  ;;  %188 = vmatpush.msra.mxu2 %v140_v28  ;;  %vm103_vm2 = vweird.f32 %v389_v17  ;;  %v233_v42 = vld [vmem:[%s677_s5 + $0x18] sm:$0xff]  ;;  %v232_v43 = vld [vmem:[%s677_s5 + $0x10] sm:$0xff]  ;;  %v231_v44 = vld [vmem:[%s677_s5 + $0x8] sm:$0xff] }
   0xf   :  { %219 = vmatpush.msra.mxu3 %v202_v29  ;;  %166 = vmatpush.msra.mxu1 %v137_v30  ;;  %v230_v46 = vld [vmem:[%s677_s5] sm:$0xff]  ;;  %v317_v4 = vld [vmem:[%s678_s6 + $0x38] sm:$0xff] }
  0x10   :  { %79 = vmatpush.msra.mxu0 %v53_v5  ;;  %v100_v19 = vsub.f32 1.0, %v99_v18  ;;  %189 = vmatpush.msra.mxu2 %v138_v31  ;;  %v386_v57 = vld [vmem:[%s674_s2] ss:$0 sm:$0xff]  ;;  %v316_v5 = vld [vmem:[%s678_s6 + $0x30] sm:$0xff] }
  0x11   :  { %220 = vmatpush.msra.mxu3 %v201_v32  ;;  %246 = vmatpush.msrb.mxu1 %v237_v34 }
  0x12   :  { %80 = vmatpush.msra.mxu0 %v52_v6  ;;  %v101_v26 = vmul.f32 %v389_v17, %v100_v19  ;;  %326 = vmatpush.msrb.mxu2 %v317_v4  ;;  %v315_v6 = vld [vmem:[%s678_s6 + $0x28] sm:$0xff] }
  0x13   :  { %373 = vmatpush.msrb.mxu3 %v237_v34  ;;  %247 = vmatpush.msrb.mxu1 %v236_v35 }
  0x14   :  { %81 = vmatpush.msra.mxu0 %v51_v7  ;;  %v102_v33 = vadd.f32 %v389_v17, %v101_v26  ;;  %327 = vmatpush.msrb.mxu2 %v316_v5  ;;  %v314_v7 = vld [vmem:[%s678_s6 + $0x20] sm:$0xff] }
  0x15   :  { %361 = vmatmul.msk.f32.vlgmr.msra.gmra.mxu0 %vm59_vm0, %v521_v8  ;;  %374 = vmatpush.msrb.mxu3 %v236_v35 }
  0x16   :  { %v104_v36 = vsel %vm103_vm2, %v389_v17, %v102_v33  ;;  %248 = vmatpush.msrb.mxu1 %v235_v37  ;;  %328 = vmatpush.msrb.mxu2 %v315_v6 }
  0x17   :  { %375 = vmatpush.msrb.mxu3 %v235_v37 }
  0x18   :  { %249 = vmatpush.msrb.mxu1 %v234_v39  ;;  %329 = vmatpush.msrb.mxu2 %v314_v7 }
  0x19   :  { %376 = vmatpush.msrb.mxu3 %v234_v39 }
  0x1a   :  { %250 = vmatpush.msrb.mxu1 %v233_v42 }
  0x1b   :  { %377 = vmatpush.msrb.mxu3 %v233_v42 }
  0x1c   :  { %251 = vmatpush.msrb.mxu1 %v232_v43 }
  0x1d   :  { %362 = vmatmul.msk.f32.gmra.mxu0 %vm59_vm0, %v528_v9  ;;  %378 = vmatpush.msrb.mxu3 %v232_v43 }
  0x1e   :  { %252 = vmatpush.msrb.mxu1 %v231_v44 }
  0x1f   :  { %379 = vmatpush.msrb.mxu3 %v231_v44 }
  0x20   :  { %253 = vmatpush.msrb.mxu1 %v230_v46 }
  0x21   :  { %380 = vmatpush.msrb.mxu3 %v230_v46 }
  0x92   :  { %v532_v10 = vpop.f32.mrf.mxu0 }
  0x93   :  { %v89_v11 = vmul.f32 %v532_v10, %v532_v10 }
  0x95   :  { %v92_v12 = vsel %vm91_vm1, %v89_v11, 0.0  ;;  %v312_v11 = vld [vmem:[%s678_s6 + $0x10] sm:$0xff] }
  0x96   :  { %93 = vadd.xlane.f32.xlu0 %v92_v12  ;;  %v311_v12 = vld [vmem:[%s678_s6 + $0x8] sm:$0xff] }
  0x9a   :  { %v537_v13 = vpop.f32.mrf.mxu0 }
  0x9b   :  { %v90_v14 = vmul.f32 %v537_v13, %v537_v13 }
  0x9d   :  { %v95_v15 = vsel %vm91_vm1, %v90_v14, 0.0 }
  0x9e   :  { %96 = vadd.xlane.f32.xlu0 %v95_v15 }
 0x109   :  { %v94_v38 = vpop.xlane.xlu0 %93 }
 0x10a   :  { %v105_v40 = vmul.f32 %v104_v36, %v94_v38 }
 0x10c   :  { %v107_v41 = vadd.f32 1e-06, %v105_v40 }
 0x10e   :  { %390 = vrsqrt.f32 %v107_v41  ;;  %vm115_vm4 = vweird.f32 %v107_v41 }
 0x111   :  { %v97_v45 = vpop.xlane.xlu0 %96 }
 0x112   :  { %v106_v47 = vmul.f32 %v104_v36, %v97_v45 }
 0x114   :  { %v391_v48 = vpop.eup %390  ;;  %v108_v49 = vadd.f32 1e-06, %v106_v47  ;;  %v387_v47 = vld [vmem:[%s679_s7] ss:$0 sm:$0xff] }
 0x115   :  { %v110_v50 = vmul.f32 %v391_v48, %v107_v41  ;;  %vm116_vm3 = vweird.f32 %v391_v48 }
 0x116   :  { %392 = vrsqrt.f32 %v108_v49  ;;  %vm117_vm5 = vmor %vm115_vm4, %vm116_vm3  ;;  %vm125_vm7 = vweird.f32 %v108_v49 }
 0x117   :  { %v111_v51 = vmul.f32 %v391_v48, %v110_v50  ;;  %394 = vrcp.f32 %v430_v24 }
 0x119   :  { %v112_v52 = vmul.f32 0.5, %v111_v51 }
 0x11b   :  { %v113_v53 = vsub.f32 1.5, %v112_v52 }
 0x11c   :  { %v393_v54 = vpop.eup %392 }
 0x11d   :  { %v114_v55 = vmul.f32 %v391_v48, %v113_v53  ;;  %v120_v56 = vmul.f32 %v393_v54, %v108_v49  ;;  %vm126_vm6 = vweird.f32 %v393_v54  ;;  %v395_v25 = vpop.eup %394 }
 0x11e   :  { %vm127_vm8 = vmor %vm125_vm7, %vm126_vm6  ;;  %v270_v26 = vmul.f32 64.0, %v395_v25  ;;  %vm274_vm9 = vweird.f32 %v395_v25 }
 0x11f   :  { %v121_v58 = vmul.f32 %v393_v54, %v120_v56  ;;  %v118_v59 = vsel %vm117_vm5, %v391_v48, %v114_v55 }
 0x120   :  { %v129_v60 = vmul.f32 %v118_v59, %v532_v10  ;;  %v313_v10 = vld [vmem:[%s678_s6 + $0x18] sm:$0xff]  ;;  %v271_v27 = vsub.f32 1.0, %v270_v26 }
 0x121   :  { %v122_v61 = vmul.f32 0.5, %v121_v58  ;;  %330 = vmatpush.msrb.mxu2 %v313_v10 }
 0x122   :  { %v135_v62 = vmul.f32 %v386_v57, %v129_v60  ;;  %v272_v28 = vmul.f32 %v395_v25, %v271_v27 }
 0x123   :  { %v123_v63 = vsub.f32 1.5, %v122_v61  ;;  %331 = vmatpush.msrb.mxu2 %v312_v11 }
 0x124   :  { %363 = vmatmul.msk.f32.vlgmr.msra.gmra.mxu1 %vm91_vm1, %v135_v62  ;;  %365 = vmatmul.msk.f32.vlgmr.msra.gmra.mxu2 %vm91_vm1, %v135_v62  ;;  %v273_v29 = vadd.f32 %v395_v25, %v272_v28 }
 0x125   :  { %v124_v0 = vmul.f32 %v393_v54, %v123_v63  ;;  %367 = vmatmul.msk.f32.vlgmr.msra.gmra.mxu3 %vm91_vm1, %v135_v62  ;;  %332 = vmatpush.msrb.mxu2 %v311_v12 }
 0x126   :  { %v275_v31 = vsel %vm274_vm9, %v395_v25, %v273_v29 }
 0x127   :  { %v128_v1 = vsel %vm127_vm8, %v393_v54, %v124_v0 }
 0x128   :  { %v130_v2 = vmul.f32 %v128_v1, %v537_v13  ;;  %v310_v13 = vld [vmem:[%s678_s6] sm:$0xff] }
 0x129   :  { %333 = vmatpush.msrb.mxu2 %v310_v13 }
 0x12a   :  { %v136_v3 = vmul.f32 %v386_v57, %v130_v2 }
 0x12c   :  { %364 = vmatmul.msk.f32.gmra.mxu1 %vm91_vm1, %v136_v3  ;;  %366 = vmatmul.msk.f32.gmra.mxu2 %vm91_vm1, %v136_v3 }
 0x12d   :  { %368 = vmatmul.msk.f32.gmra.mxu3 %vm91_vm1, %v136_v3 }
 0x134   :  { %369 = vmatmul.msk.f32.vlgmr.msrb.gmra.mxu1 %vm59_vm0, %v521_v8  ;;  %371 = vmatmul.msk.f32.vlgmr.msrb.gmra.mxu2 %vm59_vm0, %v521_v8 }
 0x135   :  { %370 = vmatmul.msk.f32.vlgmr.msrb.gmra.mxu3 %vm59_vm0, %v528_v9 }
 0x13c   :  { %372 = vmatmul.msk.f32.gmra.mxu2 %vm59_vm0, %v528_v9 }
 0x1a1   :  { %v168_v14 = vpop.f32.mrf.mxu1 }
 0x1a2   :  { %197 = vst [vmem:[%s680_s8] sm:$0xff] %v168_v14 }
 0x1a7   :  { %v191_v15 = vpop.f32.mrf.mxu2 }
 0x1a8   :  { %198 = vst [vmem:[%s680_s8 + $0x8] sm:$0xff] %v191_v15  ;;  %v222_v16 = vpop.f32.mrf.mxu3 }
 0x1a9   :  { %228 = vst.msk [vmem:[%s681_s9] sm:$0xff] %vm59_vm0, %v222_v16  ;;  %v171_v8 = vpop.f32.mrf.mxu1 }
 0x1aa   :  { %199 = vst [vmem:[%s680_s8 + $0x10] sm:$0xff] %v171_v8 }
 0x1af   :  { %v194_v17 = vpop.f32.mrf.mxu2 }
 0x1b0   :  { %200 = vst [vmem:[%s680_s8 + $0x18] sm:$0xff] %v194_v17  ;;  %v225_v18 = vpop.f32.mrf.mxu3 }
 0x1b1   :  { %229 = vst.msk [vmem:[%s681_s9 + $0x8] sm:$0xff] %vm59_vm0, %v225_v18  ;;  %v255_v9 = vpop.f32.mrf.mxu1 }
 0x1b2   :  { %v261_v19 = vmul.f32 %v255_v9, %v255_v9 }
 0x1b4   :  { %v263_v20 = vsel %vm59_vm0, %v261_v19, 0.0 }
 0x1b5   :  { %264 = vadd.xlane.f32.xlu1 %v263_v20 }
 0x1b7   :  { %v335_v30 = vpop.f32.mrf.mxu2 }
 0x1b8   :  { %v258_v21 = vpop.f32.mrf.mxu3  ;;  %342 = vst.msk [vmem:[%s683_s11] sm:$0xff] %vm341_vm10, %v335_v30 }
 0x1b9   :  { %v262_v22 = vmul.f32 %v258_v21, %v258_v21 }
 0x1bb   :  { %v266_v23 = vsel %vm59_vm0, %v262_v22, 0.0 }
 0x1bd   :  { %267 = vadd.xlane.f32.xlu1 %v266_v23 }
 0x1bf   :  { %v338_v35 = vpop.f32.mrf.mxu2 }
 0x1c0   :  { %343 = vst.msk [vmem:[%s683_s11 + $0x8] sm:$0xff] %vm341_vm10, %v338_v35 }
 0x228   :  { %v265_v32 = vpop.xlane.xlu1 %264 }
 0x229   :  { %v276_v33 = vmul.f32 %v275_v31, %v265_v32 }
 0x22b   :  { %v278_v34 = vadd.f32 1e-06, %v276_v33 }
 0x22d   :  { %396 = vrsqrt.f32 %v278_v34  ;;  %vm286_vm12 = vweird.f32 %v278_v34 }
 0x230   :  { %v268_v36 = vpop.xlane.xlu1 %267 }
 0x231   :  { %v277_v37 = vmul.f32 %v275_v31, %v268_v36 }
 0x233   :  { %v397_v38 = vpop.eup %396  ;;  %v279_v39 = vadd.f32 1e-06, %v277_v37 }
 0x234   :  { %v281_v40 = vmul.f32 %v397_v38, %v278_v34  ;;  %vm287_vm11 = vweird.f32 %v397_v38 }
 0x235   :  { %398 = vrsqrt.f32 %v279_v39  ;;  %vm288_vm13 = vmor %vm286_vm12, %vm287_vm11  ;;  %vm296_vm15 = vweird.f32 %v279_v39 }
 0x236   :  { %v282_v41 = vmul.f32 %v397_v38, %v281_v40 }
 0x238   :  { %v283_v42 = vmul.f32 0.5, %v282_v41 }
 0x23a   :  { %v284_v43 = vsub.f32 1.5, %v283_v42 }
 0x23b   :  { %v399_v44 = vpop.eup %398 }
 0x23c   :  { %v285_v45 = vmul.f32 %v397_v38, %v284_v43  ;;  %v291_v46 = vmul.f32 %v399_v44, %v279_v39  ;;  %vm297_vm14 = vweird.f32 %v399_v44 }
 0x23d   :  { %vm298_vm1 = vmor %vm296_vm15, %vm297_vm14 }
 0x23e   :  { %v289_v48 = vsel %vm288_vm13, %v397_v38, %v285_v45  ;;  %v292_v49 = vmul.f32 %v399_v44, %v291_v46 }
 0x23f   :  { %v300_v50 = vmul.f32 %v289_v48, %v255_v9 }
 0x240   :  { %v293_v51 = vmul.f32 0.5, %v292_v49 }
 0x241   :  { %v306_v52 = vmul.f32 %v387_v47, %v300_v50 }
 0x242   :  { %v294_v53 = vsub.f32 1.5, %v293_v51 }
 0x243   :  { %308 = vst.msk [vmem:[%s682_s10] sm:$0xff] %vm59_vm0, %v306_v52 }
 0x244   :  { %v295_v54 = vmul.f32 %v399_v44, %v294_v53 }
 0x246   :  { %v299_v55 = vsel %vm298_vm1, %v399_v44, %v295_v54 }
 0x247   :  { %v301_v56 = vmul.f32 %v299_v55, %v258_v21 }
 0x249   :  { %v307_v57 = vmul.f32 %v387_v47, %v301_v56 }
 0x24b   :  { %309 = vst.msk [vmem:[%s682_s10 + $0x8] sm:$0xff] %vm59_vm0, %v307_v57 }
 0x24c   :  { %360 = vsyncpa [#allocation3], 1 }

// kernel: mla_forward.3
= control target key start
LH: loop header
LB: loop body
LE: loop exit
PB: predicated region body
PF: predicated region fallthrough
CT: control target
= control target key end

     0   :  { %9 = vsyncpa [#allocation3], 0  ;;  %s1067_s0 = inlined_call_operand.vmem [shape: f32[2,32,80], index: 0, kind: input, shape index: {}]   ;;  %s1068_s1 = inlined_call_operand.vmem [shape: f32[2,8,80], index: 1, kind: input, shape index: {}]   ;;  %s1069_s2 = inlined_call_operand.vmem [shape: f32[2,8,64], index: 2, kind: input, shape index: {}]   ;;  %s1070_s3 = inlined_call_operand.vmem [shape: f32[4,64,64], index: 3, kind: input, shape index: {}]   ;;  %s1071_s4 = inlined_call_operand.hbm [shape: f32[2,8,64], index: 4, kind: output, shape index: {}]  }
   0x1   :  { %11 = vsyncpa [#allocation3 + $0x1], 0  ;;  %s855_s15 = smov 0   ;;  %s857_s16 = smov 0  }
   0x2   :  { %s859_s17 = smov 0   ;;  %s861_s18 = smov 0  }
   0x3 LB: > { %s876_s19 = sadd.s32 4294967295, %s828_s18   ;;  %s660_s20 = sadd.s32 4294967294, %s828_s18   ;;  %s828_s18 = sphi %s861_s18, %s1077_s18   ;;  %s824_s17 = sphi %s859_s17, %s1076_s17   ;;  %s820_s16 = sphi %s857_s16, %s1075_s16   ;;  %s816_s15 = sphi %s855_s15, %s1074_s15  }
   0x4   : > { %s880_s21 = sadd.s32 1, %s828_s18   ;;  %s123_s22 = sadd.s32 1, %s824_s17 }
   0x5   : > { %s120_s23 = ssub.s32 %s828_s18, %s880_s21  ;;  %p133_p0 = scmp.ne.s32.totalorder %s824_s17, %s820_s16 }
   0x6   : > { %p121_p1 = scmp.eq.s32.totalorder %s120_s23, 0  ;;  %p134_p2 = scmp.eq.s32.totalorder %s876_s19, 1 }
   0x7   : > { %p139_p3 = scmp.ne.s32.totalorder %s820_s16, %s816_s15  ;;  %p140_p4 = scmp.eq.s32.totalorder %s660_s20, 1 }
   0x8   : > { %s891_s24 = scalar_select %p121_p1, %s824_s17, %s123_s22  }
   0x9   : > { %p893_p5 = por %p134_p2, %p133_p0  ;;  %p897_p6 = por %p140_p4, %p139_p3 }
   0xa   : > { %p663_p7 = scmp.ge.s32.totalorder %s828_s18, 1  ;;  %p183_p8 = scmp.lt.s32.totalorder %s828_s18, 3 }
   0xc   : > { %p184_p9 = pnand %p663_p7, %p183_p8 }
   0xd   : > { %p217_p10 = scmp.lt.s32.totalorder (!%p184_p9), %s876_s19, 1  ;;  %s707_s11 = sshll.u32 (!%p184_p9), %s876_s19, 3 }
   0xe   : > { %187 = sbr.rel (%p184_p9) target bundleno = 695 (0x2b7), region = 36  ;;  %s572_s14 = scalar_lea.hbm (!%p184_p9), %s1071_s4, %s707_s11 }
   0xf   : > { %s576_s23 = sshll.u32 (!%p184_p9), %s572_s14, 4  ;;  %s786_s5 = scalar_lea.hbm (!%p184_p9), %s1071_s4, 16  ;;  %s577_s23 = int_to_ptr.hbm [resolvable:$true] %s576_s23 }
  0x13   : > { %s905_s27 = scalar_select %p217_p10, %s876_s19, 1  ;;  %vm235_vm0 = vcmask 654336   ;;  %v280_v5 = vlaneseq  ;;  %vm343_vm2 = vcmask 64512   ;;  %v437_v49 = vld [vmem:[%s1070_s3 + $0x38] sm:$0xff]  ;;  %v436_v51 = vld [vmem:[%s1070_s3 + $0x30] sm:$0xff]  ;;  %v435_v53 = vld [vmem:[%s1070_s3 + $0x28] sm:$0xff] }
  0x14   : > { %v685_v50 = vld [vmem:[%s1070_s3 + $0x78] sm:$0xff]  ;;  %482 = vmatpush.msra.mxu3 %v437_v49  ;;  %v684_v52 = vld [vmem:[%s1070_s3 + $0x70] sm:$0xff]  ;;  %v683_v54 = vld [vmem:[%s1070_s3 + $0x68] sm:$0xff]  ;;  %vm447_vm6 = vcmask 523264  }
  0x15   : > { %s710_s28 = sshll.u32 %s905_s27, 5  ;;  %s667_s29 = sshll.u32 %s905_s27, 3  ;;  %v281_v6 = vshrl.u32 %v280_v5, 7  ;;  %v334_v8 = vand.u32 127, %v280_v5  ;;  %459 = vmatpush.msra.mxu2 %v685_v50  ;;  %v434_v55 = vld [vmem:[%s1070_s3 + $0x20] sm:$0xff]  ;;  %v433_v60 = vld [vmem:[%s1070_s3 + $0x18] sm:$0xff] }
  0x16   : > { %s225_s6 = scalar_lea.vmem %s1068_s1, %s667_s29  ;;  %s221_s9 = scalar_lea.vmem %s1067_s0, %s710_s28  ;;  %483 = vmatpush.msra.mxu3 %v436_v51  ;;  %v682_v56 = vld [vmem:[%s1070_s3 + $0x60] sm:$0xff]  ;;  %v681_v61 = vld [vmem:[%s1070_s3 + $0x58] sm:$0xff]  ;;  %v432_v62 = vld [vmem:[%s1070_s3 + $0x10] sm:$0xff] }
  0x17   : > { %v234_v0 = vld [vmem:[%s225_s6] sm:$0xff]  ;;  %v231_v2 = vld [vmem:[%s221_s9 + $0x8] sm:$0xff]  ;;  %v232_v3 = vld [vmem:[%s221_s9 + $0x10] sm:$0xff]  ;;  %v289_v7 = vand.u32 7, %v281_v6  ;;  %v282_v9 = vadd.s32 8, %v281_v6  ;;  %v283_v14 = vadd.s32 16, %v281_v6  ;;  %s229_s12 = scalar_lea.vmem %s1069_s2, %s667_s29  ;;  %460 = vmatpush.msra.mxu2 %v684_v52 }
  0x18   : > { %669 = vmatpush.xpose.msk.msra.mxu0 %vm235_vm0, %v234_v0  ;;  %v230_v1 = vld [vmem:[%s221_s9] sm:$0xff]  ;;  %v233_v4 = vld [vmem:[%s221_s9 + $0x18] sm:$0xff]  ;;  %v284_v19 = vadd.s32 24, %v281_v6  ;;  %484 = vmatpush.msra.mxu3 %v435_v53  ;;  %v680_v63 = vld [vmem:[%s1070_s3 + $0x50] sm:$0xff]  ;;  %s214_s9 = sand.u32 1, %s820_s16   ;;  %s780_s27 = sshra.s32 %s577_s23, 4  ;;  %s781_s27 = int_to_ptr.hbm [resolvable:$true] %s780_s27 }
  0x19   : > { %vm335_vm1 = vcmp.ge.s32.totalorder %v289_v7, %v334_v8  ;;  %v296_v13 = vand.u32 7, %v282_v9  ;;  %v303_v18 = vand.u32 7, %v283_v14  ;;  %v388_v47 = vld [vmem:[%s229_s12] sm:$0xff]  ;;  %461 = vmatpush.msra.mxu2 %v683_v54  ;;  %v431_v0 = vld [vmem:[%s1070_s3 + $0x8] sm:$0xff]  ;;  %s664_s10 = sshll.u32 %s214_s9, 3  ;;  %s562_s28 = scalar_lea.sflag [#allocation3], %s214_s9 }
  0x1a   : > { %v310_v23 = vand.u32 7, %v284_v19  ;;  %416 = vmatpush.msra.mxu1 %v388_v47  ;;  %485 = vmatpush.msra.mxu3 %v434_v55  ;;  %v693_v14 = vld [vmem:[%s1070_s3 + $0xa8] sm:$0xff]  ;;  %v703_v19 = vld [vmem:[%s1070_s3 + $0xf0] sm:$0xff]  ;;  %s216_s20 = scalar_lea.vmem [#allocation2], %s664_s10  ;;  %s782_s19 = scalar_lea.hbm %s781_s27, 8 }
  0x1b   : > { %670 = vmatmul.msk.f32.vlgmr.msra.gmra.mxu0 %vm235_vm0, %v230_v1  ;;  %vm336_vm3 = vcmp.ge.s32.totalorder %v296_v13, %v334_v8  ;;  %vm337_vm4 = vcmp.ge.s32.totalorder %v303_v18, %v334_v8  ;;  %462 = vmatpush.msra.mxu2 %v682_v56  ;;  %v679_v1 = vld [vmem:[%s1070_s3 + $0x48] sm:$0xff]  ;;  %v694_v13 = vld [vmem:[%s1070_s3 + $0xb0] sm:$0xff]  ;;  %s574_s22 = sshll.u32 %s216_s20, 4  ;;  %p783_p11 = scmp.ne.s32.totalorder %s781_s27, %s782_s19  ;;  %s575_s22 = int_to_ptr.vmem [resolvable:$true] %s574_s22 }
  0x1c   : > { %vm338_vm5 = vcmp.ge.s32.totalorder %v310_v23, %v334_v8  ;;  %486 = vmatpush.msra.mxu3 %v433_v60  ;;  %v690_v18 = vld [vmem:[%s1070_s3 + $0x90] sm:$0xff]  ;;  %v701_v23 = vld [vmem:[%s1070_s3 + $0xe0] sm:$0xff]  ;;  %p787_p0 = scmp.lt.s32.totalorder %s781_s27, %s1071_s4  ;;  %p788_p1 = scmp.lt.s32.totalorder %s786_s5, %s782_s19 }
  0x1d   : > { %463 = vmatpush.msra.mxu2 %v681_v61  ;;  %p784_p12 = pnand %p783_p11, %p893_p5 }
  0x1e   : > { %487 = vmatpush.msra.mxu3 %v432_v62  ;;  %p789_p2 = por %p788_p1, %p787_p0 }
  0x1f   : > { %464 = vmatpush.msra.mxu2 %v680_v63  ;;  %p785_p13 = pneg %p784_p12 }
  0x20   : > { %488 = vmatpush.msra.mxu3 %v431_v0 }
  0x21   : > { %465 = vmatpush.msra.mxu2 %v679_v1  ;;  %p790_p3 = pnand %p789_p2, %p785_p13 }
  0x23   : > { %671 = vmatmul.msk.f32.gmra.mxu0 %vm235_vm0, %v231_v2 }
  0x2b   : > { %672 = vmatmul.msk.f32.gmra.mxu0 %vm235_vm0, %v232_v3 }
  0x33   : > { %673 = vmatmul.msk.f32.gmra.mxu0 %vm235_vm0, %v233_v4 }
  0x98   : > { %v268_v10 = vpop.f32.mrf.mxu0 }
  0x99   : > { %v339_v11 = vsel %vm335_vm1, %v268_v10, -1e+30  ;;  %v430_v10 = vld [vmem:[%s1070_s3] sm:$0xff] }
  0x9a   : > { %v344_v12 = vsel %vm343_vm2, %v339_v11, -inf  ;;  %489 = vmatpush.msra.mxu3 %v430_v10 }
  0x9b   : > { %345 = vmax.xlane.f32.xlu0 %v344_v12  ;;  %v695_v12 = vld [vmem:[%s1070_s3 + $0xb8] sm:$0xff] }
  0xa0   : > { %v271_v15 = vpop.f32.mrf.mxu0 }
  0xa1   : > { %v340_v16 = vsel %vm336_vm3, %v271_v15, -1e+30  ;;  %v692_v15 = vld [vmem:[%s1070_s3 + $0xa0] sm:$0xff] }
  0xa2   : > { %v347_v17 = vsel %vm343_vm2, %v340_v16, -inf }
  0xa3   : > { %348 = vmax.xlane.f32.xlu0 %v347_v17  ;;  %v704_v17 = vld [vmem:[%s1070_s3 + $0xf8] sm:$0xff] }
  0xa4   : > { %547 = vmatpush.msrb.mxu3 %v704_v17 }
  0xa6   : > { %548 = vmatpush.msrb.mxu3 %v703_v19 }
  0xa8   : > { %v274_v20 = vpop.f32.mrf.mxu0 }
  0xa9   : > { %v341_v21 = vsel %vm337_vm4, %v274_v20, -1e+30  ;;  %v689_v20 = vld [vmem:[%s1070_s3 + $0x88] sm:$0xff] }
  0xaa   : > { %v350_v22 = vsel %vm343_vm2, %v341_v21, -inf }
  0xab   : > { %351 = vmax.xlane.f32.xlu1 %v350_v22  ;;  %v688_v22 = vld [vmem:[%s1070_s3 + $0x80] sm:$0xff] }
  0xb0   : > { %v277_v24 = vpop.f32.mrf.mxu0 }
  0xb1   : > { %v342_v25 = vsel %vm338_vm5, %v277_v24, -1e+30  ;;  %v700_v24 = vld [vmem:[%s1070_s3 + $0xd8] sm:$0xff] }
  0xb2   : > { %v353_v26 = vsel %vm343_vm2, %v342_v25, -inf }
  0xb3   : > { %354 = vmax.xlane.f32.xlu1 %v353_v26  ;;  %v698_v26 = vld [vmem:[%s1070_s3 + $0xc8] sm:$0xff] }
 0x10e   : > { %v346_v27 = vpop.xlane.xlu0 %345 }
 0x10f   : > { %v356_v28 = vsub.f32 %v339_v11, %v346_v27  ;;  %v678_v11 = vld [vmem:[%s1070_s3 + $0x40] sm:$0xff] }
 0x110   : > { %466 = vmatpush.msra.mxu2 %v678_v11  ;;  %v697_v27 = vld [vmem:[%s1070_s3 + $0xc0] sm:$0xff] }
 0x111   : > { %v360_v29 = vmul.f32 1.442695, %v356_v28 }
 0x112   : > { %514 = vmatpush.msrb.mxu2 %v695_v12 }
 0x113   : > { %750 = vpow2.f32 %v360_v29 }
 0x114   : > { %515 = vmatpush.msrb.mxu2 %v694_v13 }
 0x116   : > { %v349_v30 = vpop.xlane.xlu0 %348  ;;  %516 = vmatpush.msrb.mxu2 %v693_v14 }
 0x117   : > { %v357_v31 = vsub.f32 %v340_v16, %v349_v30  ;;  %v691_v16 = vld [vmem:[%s1070_s3 + $0x98] sm:$0xff] }
 0x118   : > { %517 = vmatpush.msrb.mxu2 %v692_v15 }
 0x119   : > { %v751_v32 = vpop.eup %750  ;;  %v362_v33 = vmul.f32 1.442695, %v357_v31 }
 0x11a   : > { %v368_v34 = vsel %vm343_vm2, %v751_v32, 0.0  ;;  %518 = vmatpush.msrb.mxu2 %v691_v16 }
 0x11b   : > { %752 = vpow2.f32 %v362_v33  ;;  %369 = vadd.xlane.f32.xlu2 %v368_v34 }
 0x11c   : > { %519 = vmatpush.msrb.mxu2 %v690_v18 }
 0x11e   : > { %v352_v35 = vpop.xlane.xlu1 %351  ;;  %520 = vmatpush.msrb.mxu2 %v689_v20 }
 0x11f   : > { %v358_v36 = vsub.f32 %v341_v21, %v352_v35  ;;  %v702_v21 = vld [vmem:[%s1070_s3 + $0xe8] sm:$0xff] }
 0x120   : > { %549 = vmatpush.msrb.mxu3 %v702_v21  ;;  %521 = vmatpush.msrb.mxu2 %v688_v22 }
 0x121   : > { %v753_v37 = vpop.eup %752  ;;  %v364_v38 = vmul.f32 1.442695, %v358_v36 }
 0x122   : > { %v371_v39 = vsel %vm343_vm2, %v753_v37, 0.0  ;;  %550 = vmatpush.msrb.mxu3 %v701_v23 }
 0x123   : > { %754 = vpow2.f32 %v364_v38  ;;  %372 = vadd.xlane.f32.xlu2 %v371_v39 }
 0x124   : > { %551 = vmatpush.msrb.mxu3 %v700_v24 }
 0x126   : > { %v355_v40 = vpop.xlane.xlu1 %354 }
 0x127   : > { %v359_v41 = vsub.f32 %v342_v25, %v355_v40  ;;  %v699_v25 = vld [vmem:[%s1070_s3 + $0xd0] sm:$0xff] }
 0x128   : > { %552 = vmatpush.msrb.mxu3 %v699_v25 }
 0x129   : > { %v755_v42 = vpop.eup %754  ;;  %v366_v43 = vmul.f32 1.442695, %v359_v41 }
 0x12a   : > { %v374_v44 = vsel %vm343_vm2, %v755_v42, 0.0  ;;  %553 = vmatpush.msrb.mxu3 %v698_v26 }
 0x12b   : > { %756 = vpow2.f32 %v366_v43  ;;  %375 = vadd.xlane.f32.xlu0 %v374_v44 }
 0x12c   : > { %554 = vmatpush.msrb.mxu3 %v697_v27 }
 0x131   : > { %v757_v45 = vpop.eup %756 }
 0x132   : > { %v377_v46 = vsel %vm343_vm2, %v757_v45, 0.0 }
 0x133   : > { %378 = vadd.xlane.f32.xlu1 %v377_v46 }
 0x18e   : > { %v370_v48 = vpop.xlane.xlu2 %369 }
 0x18f   : > { %758 = vrcp.f32 %v370_v48 }
 0x195   : > { %v759_v57 = vpop.eup %758 }
 0x196   : > { %v373_v58 = vpop.xlane.xlu2 %372  ;;  %v384_v59 = vmul.f32 %v759_v57, %v751_v32 }
 0x197   : > { %760 = vrcp.f32 %v373_v58 }
 0x198   : > { %674 = vmatmul.msk.f32.vlgmr.msra.gmra.mxu1 %vm343_vm2, %v384_v59 }
 0x19d   : > { %v761_v2 = vpop.eup %760 }
 0x19e   : > { %v376_v3 = vpop.xlane.xlu0 %375  ;;  %v385_v4 = vmul.f32 %v761_v2, %v753_v37 }
 0x19f   : > { %762 = vrcp.f32 %v376_v3 }
 0x1a0   : > { %675 = vmatmul.msk.f32.gmra.mxu1 %vm343_vm2, %v385_v4 }
 0x1a5   : > { %v763_v5 = vpop.eup %762 }
 0x1a6   : > { %v379_v6 = vpop.xlane.xlu1 %378  ;;  %v386_v7 = vmul.f32 %v763_v5, %v755_v42 }
 0x1a7   : > { %764 = vrcp.f32 %v379_v6 }
 0x1a8   : > { %676 = vmatmul.msk.f32.gmra.mxu1 %vm343_vm2, %v386_v7 }
 0x1ad   : > { %v765_v8 = vpop.eup %764 }
 0x1ae   : > { %v387_v9 = vmul.f32 %v765_v8, %v757_v45 }
 0x1b0   : > { %677 = vmatmul.msk.f32.gmra.mxu1 %vm343_vm2, %v387_v9 }
 0x215   : > { %v418_v28 = vpop.f32.mrf.mxu1 }
 0x216   : > { %687 = vmatmul.msk.f32.vlgmr.msra.gmra.mxu3 %vm447_vm6, %v418_v28 }
 0x21d   : > { %v421_v29 = vpop.f32.mrf.mxu1 }
 0x21e   : > { %686 = vmatmul.msk.f32.vlgmr.msra.gmra.mxu2 %vm447_vm6, %v421_v29 }
 0x225   : > { %v424_v30 = vpop.f32.mrf.mxu1 }
 0x226   : > { %696 = vmatmul.msk.f32.vlgmr.msrb.gmra.mxu2 %vm447_vm6, %v424_v30 }
 0x22d   : > { %v427_v31 = vpop.f32.mrf.mxu1 }
 0x22e   : > { %705 = vmatmul.msk.f32.vlgmr.msrb.gmra.mxu3 %vm447_vm6, %v427_v31 }
 0x299   : > { %v491_v33 = vpop.f32.mrf.mxu3 }
 0x2a1   : > { %v468_v32 = vpop.f32.mrf.mxu2 }
 0x2a2   : > { %v492_v35 = vadd.f32 %v491_v33, %v468_v32 }
 0x2a9   : > { %v523_v34 = vpop.f32.mrf.mxu2 }
 0x2aa   : > { %v526_v36 = vadd.f32 %v523_v34, %v492_v35 }
 0x2b1   : > { %v556_v37 = vpop.f32.mrf.mxu3 }
 0x2b2   : > { %v559_v38 = vadd.f32 %v556_v37, %v526_v36 }
 0x2b4   : > { %560 = vst.msk [vmem:[%s216_s20] sm:$0xff] %vm447_vm6, %v559_v38 }
 0x2b5   : > { %793 = shalt.err (!%p790_p3)
}
 0x2b6   : > { %711 = dma.vmem_to_hbm [thread:$0]  (%p893_p5), %s575_s22, 128, %s577_s23, %s562_s28  }
 0x2b7 PF: > { %p717_p4 = scmp.ge.s32.totalorder %s828_s18, 2  ;;  %s588_s8 = sand.u32 1, %s816_s15  }
 0x2b8   : > { %s589_s9 = scalar_lea.sflag [#allocation3], %s588_s8 }
 0x2b9   : > { %p714_p7 = pnand %p717_p4, %p897_p6 }
 0x2bb   : > { %p715_p8 = pneg %p714_p7 }
 0x2bd   : > { %811 = dma.done.wait (%p715_p8), %s589_s9, 128  }
 0x2be   : > { %813 = vsyncadd (%p715_p8), %s589_s9, 4294967168  ;;  %p14_p9 = scmp.ge.s32.totalorder %s880_s21, 4   ;;  %s1074_s15 = smov %s820_s16 }
 0x2bf   : > { %s1075_s16 = smov %s824_s17  ;;  %s1076_s17 = smov %s891_s24 }
 0x2c0   : > { %s1077_s18 = smov %s880_s21  ;;  %16 = sbr.rel (!%p14_p9) target bundleno = 3 (0x3), region = 80 }
 0x2c5   :  { %595 = vsyncpa [#allocation3], 1 }
 0x2c6   :  { %597 = vsyncpa [#allocation3 + $0x1], 1 }

</bundles_post_ra>
